<compile_context>
chip_gen: v7x
topology: tpu7x:2x2x1
jax: 0.10.0
libtpu: 0.0.40
codegen_flags: <defaults>
</compile_context>

<pallas_src>
import jax
import jax.numpy as jnp
from jax.experimental import pallas as pl
from jax.experimental.pallas import tpu as pltpu

NUM_CLASSES = 10
PADDED_CLASSES = 128          # lane-dense output width
IN_FEATURES = 28 * 28         # 784
NEG_INF = -1e30               # finite "-inf" for padded class columns


def netlin_kernel(x_ref, w_ref, b_ref, o_ref):
    # x_ref: (TB, 784)       input rows (f32 or bf16)
    # w_ref: (784, 128) f32  W^T padded with zero columns for classes 10..127
    # b_ref: (1, 128)   f32  bias padded with NEG_INF for classes 10..127
    # o_ref: (TB, 128)  f32
    x = x_ref[...]
    w = w_ref[...]
    b = b_ref[...]

    # Linear: x @ W^T + b  (MXU matmul, f32 accumulate). Padded columns get
    # logit ~= NEG_INF so they never win the max and exp() underflows to 0,
    # keeping the 10-class log-softmax exact.
    logits = jnp.dot(x, w, preferred_element_type=jnp.float32) + b

    # Numerically stable LogSoftmax over the class (lane) axis.
    m = jnp.max(logits, axis=-1, keepdims=True)
    shifted = logits - m
    l = jnp.sum(jnp.exp(shifted), axis=-1, keepdims=True)
    o_ref[...] = shifted - jnp.log(l)


def _round_up(n, m):
    return ((n + m - 1) // m) * m


def _choose_tile(B, tb):
    """Pick a sublane-aligned (multiple-of-8) batch tile.

    Capped near half the (rounded-up) batch so the grid has >= 2 steps
    whenever B > 8, letting both v7x TensorCores work; no-op on v5e/v6e.
    """
    b8 = _round_up(B, 8)
    half = _round_up(b8 // 2, 8) if b8 > 8 else 8
    return max(8, min(tb, half))


def netlin_forward(x_nchw, weight, bias, *, tb=1024, x_dtype=jnp.float32,
                   return_padded=False):
    """x_nchw: (B, 1, 28, 28); weight: (10, 784); bias: (10,) -> (B, 10) log-probs.

    Set x_dtype=jnp.bfloat16 for ~1.8x on this HBM-bound kernel (input
    rounding only changes numerics slightly). Set return_padded=True to get
    the lane-dense (B, 128) output (cols 10..127 ~= -inf) and skip the slice.
    """
    B = x_nchw.shape[0]
    x_flat = x_nchw.reshape(B, IN_FEATURES).astype(x_dtype)   # x.view(B, -1)

    TB = _choose_tile(B, tb)
    grid = pl.cdiv(B, TB)   # partial last block handled by Pallas (masked IO)

    # Pad W^T to (784, 128) with zero columns, bias to (1, 128) with NEG_INF.
    w_t = weight.T.astype(jnp.float32)                         # (784, 10)
    w_pad = jnp.pad(w_t, ((0, 0), (0, PADDED_CLASSES - NUM_CLASSES)))
    b_pad = jnp.full((1, PADDED_CLASSES), NEG_INF, jnp.float32)
    b_pad = b_pad.at[0, :NUM_CLASSES].set(bias.astype(jnp.float32))

    # Explicit scoped-VMEM budget: double-buffered x / out tiles + resident
    # weight/bias + compiler scratch headroom. Floored at 16 MiB (v5e default).
    x_bytes = jnp.dtype(x_dtype).itemsize
    vmem_limit = int(
        2 * TB * IN_FEATURES * x_bytes
        + 2 * TB * PADDED_CLASSES * 4
        + 2 * IN_FEATURES * PADDED_CLASSES * 4
        + 2 * 8 * PADDED_CLASSES * 4
        + (4 << 20))
    vmem_limit = max(vmem_limit, 16 << 20)

    out = pl.pallas_call(
        netlin_kernel,
        out_shape=jax.ShapeDtypeStruct((B, PADDED_CLASSES), jnp.float32),
        grid_spec=pl.GridSpec(
            grid=(grid,),
            in_specs=[
                pl.BlockSpec((TB, IN_FEATURES), lambda i: (i, 0)),
                pl.BlockSpec((IN_FEATURES, PADDED_CLASSES), lambda i: (0, 0)),
                pl.BlockSpec((1, PADDED_CLASSES), lambda i: (0, 0)),
            ],
            out_specs=pl.BlockSpec((TB, PADDED_CLASSES), lambda i: (i, 0)),
        ),
        compiler_params=pltpu.CompilerParams(
            dimension_semantics=("parallel",),
            vmem_limit_bytes=vmem_limit,
        ),
    )(x_flat, w_pad, b_pad)

    if return_padded:
        return out                     # (B, 128); cols 10..127 are ~ -inf
    return out[:, :NUM_CLASSES]        # (B, 10), matches the PyTorch module


def init_params(key):
    # Deterministic init mimicking nn.Linear defaults: U(-1/sqrt(fan_in), +)
    kw, kb = jax.random.split(key)
    bound = 1.0 / jnp.sqrt(jnp.float32(IN_FEATURES))
    weight = jax.random.uniform(kw, (NUM_CLASSES, IN_FEATURES), jnp.float32,
                                -bound, bound)
    bias = jax.random.uniform(kb, (NUM_CLASSES,), jnp.float32, -bound, bound)
    return weight, bias


if __name__ == "__main__":
    key = jax.random.PRNGKey(0)
    kx, kp = jax.random.split(key)
    weight, bias = init_params(kp)

    # B=2: single partial block. B=20: 2-step grid with a partial last block.
    for B in (2, 20):
        kx, sub = jax.random.split(kx)
        x = jax.random.normal(sub, (B, 1, 28, 28), jnp.float32)  # NCHW
        out = jax.block_until_ready(netlin_forward(x, weight, bias))

        ref_logits = x.reshape(B, -1) @ weight.T + bias
        ref = jax.nn.log_softmax(ref_logits, axis=-1)
        assert out.shape == (B, NUM_CLASSES)
        assert jnp.allclose(out, ref, atol=1e-5, rtol=1e-5)

    print("KERNEL_OK")
</pallas_src>

<mosaic_0001>
module attributes {stable_mosaic.version = 11 : i64} {
  func.func @netlin_kernel(%arg0: i32, %arg1: memref<8x784xf32, #tpu.memory_space<vmem>>, %arg2: memref<784x128xf32, #tpu.memory_space<vmem>>, %arg3: memref<1x128xf32, #tpu.memory_space<vmem>>, %arg4: memref<8x128xf32, #tpu.memory_space<vmem>>) attributes {dimension_semantics = [#tpu.dimension_semantics<parallel>], iteration_bounds = array<i64: 1>, scalar_prefetch = 0 : i64, scratch_operands = 0 : i64, tpu.core_type = #tpu.core_type<tc>, window_params = [{transform_indices = @transform_0, window_bounds = array<i64: 8, 784>}, {pipeline_mode = #tpu.pipeline_mode<synchronous>, transform_indices = @transform_1, window_bounds = array<i64: 784, 128>}, {pipeline_mode = #tpu.pipeline_mode<synchronous>, transform_indices = @transform_2, window_bounds = array<i64: 1, 128>}, {transform_indices = @transform_3, window_bounds = array<i64: 8, 128>}]} {
    %c0 = arith.constant 0 : index
    %c0_0 = arith.constant 0 : index
    %0 = vector.load %arg1[%c0, %c0_0] : memref<8x784xf32, #tpu.memory_space<vmem>>, vector<8x784xf32>
    %c0_1 = arith.constant 0 : index
    %c0_2 = arith.constant 0 : index
    %1 = vector.load %arg2[%c0_1, %c0_2] : memref<784x128xf32, #tpu.memory_space<vmem>>, vector<784x128xf32>
    %c0_3 = arith.constant 0 : index
    %c0_4 = arith.constant 0 : index
    %2 = vector.load %arg3[%c0_3, %c0_4] : memref<1x128xf32, #tpu.memory_space<vmem>>, vector<1x128xf32>
    %cst = arith.constant dense<0.000000e+00> : vector<8x128xf32>
    %3 = tpu.matmul %0, %1, %cst {dimension_numbers = #tpu.dot_dimension_numbers<[1], [0], [0], [1], [0, 0, 1, 1], [], []>} : vector<8x784xf32>, vector<784x128xf32>, vector<8x128xf32> -> vector<8x128xf32>
    %4 = vector.broadcast %2 : vector<1x128xf32> to vector<8x128xf32>
    %5 = arith.addf %3, %4 : vector<8x128xf32>
    %cst_5 = arith.constant dense<0xFF800000> : vector<8xf32>
    %6 = vector.multi_reduction <maximumf>, %5, %cst_5 [1] : vector<8x128xf32> to vector<8xf32>
    %7 = vector.shape_cast %6 : vector<8xf32> to vector<8x1xf32>
    %8 = vector.broadcast %7 : vector<8x1xf32> to vector<8x128xf32>
    %9 = arith.subf %5, %8 : vector<8x128xf32>
    %10 = math.exp %9 : vector<8x128xf32>
    %cst_6 = arith.constant dense<0.000000e+00> : vector<8xf32>
    %11 = vector.multi_reduction <add>, %10, %cst_6 [1] : vector<8x128xf32> to vector<8xf32>
    %12 = vector.shape_cast %11 : vector<8xf32> to vector<8x1xf32>
    %13 = math.log %12 : vector<8x1xf32>
    %14 = vector.broadcast %13 : vector<8x1xf32> to vector<8x128xf32>
    %15 = arith.subf %9, %14 : vector<8x128xf32>
    %c0_7 = arith.constant 0 : index
    %c0_8 = arith.constant 0 : index
    %16 = vector.load %arg4[%c0_7, %c0_8] : memref<8x128xf32, #tpu.memory_space<vmem>>, vector<8x128xf32>
    tpu.vector_store %arg4[%c0_7, %c0_8], %15 {strides = array<i32>} : memref<8x128xf32, #tpu.memory_space<vmem>>, vector<8x128xf32>,
    return
  }
  func.func @transform_0(%arg0: i32) -> (i32, i32) {
    %c0_i32 = arith.constant 0 : i32
    %c0_i32_0 = arith.constant 0 : i32
    return %arg0, %c0_i32 : i32, i32
  }
  func.func @transform_1(%arg0: i32) -> (i32, i32) {
    %c0_i32 = arith.constant 0 : i32
    %c0_i32_0 = arith.constant 0 : i32
    %c0_i32_1 = arith.constant 0 : i32
    return %c0_i32, %c0_i32_0 : i32, i32
  }
  func.func @transform_2(%arg0: i32) -> (i32, i32) {
    %c0_i32 = arith.constant 0 : i32
    %c0_i32_0 = arith.constant 0 : i32
    %c0_i32_1 = arith.constant 0 : i32
    return %c0_i32, %c0_i32_0 : i32, i32
  }
  func.func @transform_3(%arg0: i32) -> (i32, i32) {
    %c0_i32 = arith.constant 0 : i32
    %c0_i32_0 = arith.constant 0 : i32
    return %arg0, %c0_i32 : i32, i32
  }
}

</mosaic_0001>

<bundles_post_ra>
// kernel: tpu_custom_call.1
= control target key start
LH: loop header
LB: loop body
LE: loop exit
PB: predicated region body
PF: predicated region fallthrough
CT: control target
= control target key end

     0   :  { %8 = vsyncpa [#allocation3], 0  ;;  %s952_s0 = inlined_call_operand.hbm [shape: f32[2,784], index: 0, kind: input, shape index: {}]   ;;  %s953_s1 = inlined_call_operand.hbm [shape: f32[784,128], index: 1, kind: input, shape index: {}]   ;;  %s954_s2 = inlined_call_operand.vmem [shape: f32[1,128], index: 2, kind: input, shape index: {}]   ;;  %s955_s3 = inlined_call_operand.hbm [shape: f32[2,128], index: 3, kind: output, shape index: {}]  }
   0x1   :  { %9 = vsyncpa [#allocation6], 0 }
   0x2   :  { %10 = vsyncpa [#allocation4], 0 }
   0x3   :  { %15 = vsyncadd [#allocation3], 672  ;;  %s870_s12 = smov [#allocation2]   ;;  %s798_s16 = scalar_lea.hbm %s952_s0, 224 }
   0x4   :  { %s16_s13 = sshll.u32 %s870_s12, 4  ;;  %p799_p0 = scmp.ne.s32.totalorder %s952_s0, %s798_s16  ;;  %s17_s13 = int_to_ptr.vmem [resolvable:$true] %s16_s13 }
   0x5   :  { %p802_p1 = scmp.lt.u32.totalorder %s798_s16, %s952_s0 }
   0x7   :  { %p804_p2 = pnand %p802_p1, %p799_p0 }
   0x9   :  { %807 = shalt.err (!%p804_p2)
}
   0xa   :  { %s808_s21 = scalar_lea.vmem %s17_s13, 224  ;;  %s812_s22 = scalar_lea.vmem %s17_s13, 896 }
   0xb   :  { %p809_p3 = scmp.ne.s32.totalorder %s17_s13, %s808_s21  ;;  %p813_p4 = scmp.lt.s32.totalorder %s17_s13, %s17_s13 }
   0xc   :  { %p814_p5 = scmp.lt.s32.totalorder %s812_s22, %s808_s21 }
   0xe   :  { %p815_p6 = por %p814_p5, %p813_p4 }
  0x10   :  { %p816_p7 = pnand %p815_p6, %p809_p3 }
  0x12   :  { %819 = shalt.err (!%p816_p7)
}
  0x13   :  { %s871_s23 = smov 224   ;;  %s872_s24 = smov 14  }
  0x14   :  { %22 = dma.hbm_to_vmem [thread:$0]  %s952_s0, 224, %s17_s13, [#allocation3], %s871_s23, %s871_s23, %s872_s24  }
  0x15   :  { %s873_s27 = smov [#allocation5]   ;;  %s820_s4 = scalar_lea.hbm %s953_s1, 12544 }
  0x16   :  { %s28_s28 = sshll.u32 %s873_s27, 4  ;;  %p821_p8 = scmp.ne.s32.totalorder %s953_s1, %s820_s4  ;;  %s29_s28 = int_to_ptr.vmem [resolvable:$true] %s28_s28 }
  0x17   :  { %p824_p9 = scmp.lt.u32.totalorder %s820_s4, %s953_s1 }
  0x19   :  { %p826_p10 = pnand %p824_p9, %p821_p8 }
  0x1b   :  { %829 = shalt.err (!%p826_p10)
}
  0x1c   :  { %s830_s9 = scalar_lea.vmem %s29_s28, 12544  ;;  %p835_p12 = scmp.lt.s32.totalorder %s29_s28, %s29_s28 }
  0x1d   :  { %p831_p11 = scmp.ne.s32.totalorder %s29_s28, %s830_s9  ;;  %p836_p13 = scmp.lt.s32.totalorder %s830_s9, %s830_s9 }
  0x1f   :  { %p837_p0 = por %p836_p13, %p835_p12 }
  0x21   :  { %p838_p1 = pnand %p837_p0, %p831_p11 }
  0x23   :  { %841 = shalt.err (!%p838_p1)
}
  0x24   :  { %s874_s0 = smov 128   ;;  %s875_s10 = smov 8  }
  0x25   :  { %34 = dma.hbm_to_vmem [thread:$0]  %s953_s1, 12544, %s29_s28, [#allocation6], %s874_s0, %s874_s0, %s875_s10  }
  0x26   :  { %864 = dma.done.wait [#allocation3], 896  }
  0x27   :  { %865 = vsyncadd [#allocation3], 4294966400 }
  0x28   :  { %866 = dma.done.wait [#allocation6], 12544  }
  0x29   :  { %867 = vsyncadd [#allocation6], 4294954752  ;;  %v67_v0 = vld [vmem:[#allocation5 + $0x80] sm:$0xff]  ;;  %v68_v1 = vld [vmem:[#allocation5 + $0x88] sm:$0xff]  ;;  %v876_v51 = vmov 1983009808   ;;  %v171_v53 = vlaneseq }
  0x2a   :  { %v51_v2 = vld [vmem:[#allocation5] sm:$0xff]  ;;  %v670_v3 = vpack.c.bf16 %v68_v1, %v67_v0  ;;  %v52_v4 = vld [vmem:[#allocation5 + $0x8] sm:$0xff]  ;;  %v69_v11 = vld [vmem:[#allocation5 + $0x90] sm:$0xff]  ;;  %v169_v52 = vunpack.c.l.s4 %v876_v51  ;;  %vm878_vm0 = vmmov 0   ;;  %vm241_vm1 = vcmask 130048  }
  0x2b   :  { %v99_v5 = vld [vmem:[#allocation5 + $0x180] sm:$0xff]  ;;  %v100_v6 = vld [vmem:[#allocation5 + $0x188] sm:$0xff]  ;;  %v672_v7 = vpack.c.bf16 %v52_v4, %v51_v2  ;;  %v70_v13 = vld [vmem:[#allocation5 + $0x98] sm:$0xff] }
  0x2c   :  { %v702_v8 = vpack.c.bf16 %v100_v6, %v99_v5  ;;  %v83_v9 = vld [vmem:[#allocation5 + $0x100] sm:$0xff]  ;;  %v84_v10 = vld [vmem:[#allocation5 + $0x108] sm:$0xff]  ;;  %671 = vmatprep.subr.bf16.mxu0 %v670_v3  ;;  %v53_v14 = vld [vmem:[#allocation5 + $0x10] sm:$0xff]  ;;  %v674_v16 = vpack.c.bf16 %v70_v13, %v69_v11  ;;  %v170_v2 = vunpack.c.0.s8 %v169_v52  ;;  %v172_v3 = vshrl.u32 %v171_v53, 7 }
  0x2d   :  { %v704_v12 = vpack.c.bf16 %v84_v10, %v83_v9  ;;  %v54_v15 = vld [vmem:[#allocation5 + $0x18] sm:$0xff]  ;;  %673 = vmatpush3.bf16.msra.mxu0 %v672_v7  ;;  %v101_v18 = vld [vmem:[#allocation5 + $0x190] sm:$0xff]  ;;  %v71_v23 = vld [vmem:[#allocation5 + $0xa0] sm:$0xff] }
  0x2e   :  { %703 = vmatprep.subr.bf16.mxu1 %v702_v8  ;;  %v676_v17 = vpack.c.bf16 %v54_v15, %v53_v14  ;;  %v102_v19 = vld [vmem:[#allocation5 + $0x198] sm:$0xff]  ;;  %v85_v20 = vld [vmem:[#allocation5 + $0x110] sm:$0xff]  ;;  %v72_v24 = vld [vmem:[#allocation5 + $0xa8] sm:$0xff]  ;;  %675 = vmatprep.subr.bf16.mxu0 %v674_v16 }
  0x2f   :  { %705 = vmatpush3.bf16.msra.mxu1 %v704_v12  ;;  %v706_v21 = vpack.c.bf16 %v102_v19, %v101_v18  ;;  %v86_v22 = vld [vmem:[#allocation5 + $0x118] sm:$0xff]  ;;  %v678_v26 = vpack.c.bf16 %v72_v24, %v71_v23  ;;  %v55_v27 = vld [vmem:[#allocation5 + $0x20] sm:$0xff]  ;;  %v56_v28 = vld [vmem:[#allocation5 + $0x28] sm:$0xff] }
  0x30   :  { %v708_v25 = vpack.c.bf16 %v86_v22, %v85_v20  ;;  %v103_v29 = vld [vmem:[#allocation5 + $0x1a0] sm:$0xff]  ;;  %v104_v30 = vld [vmem:[#allocation5 + $0x1a8] sm:$0xff]  ;;  %v680_v33 = vpack.c.bf16 %v56_v28, %v55_v27  ;;  %v73_v35 = vld [vmem:[#allocation5 + $0xb0] sm:$0xff] }
  0x31   :  { %707 = vmatprep.subr.bf16.mxu1 %v706_v21  ;;  %v87_v31 = vld [vmem:[#allocation5 + $0x120] sm:$0xff]  ;;  %v88_v32 = vld [vmem:[#allocation5 + $0x128] sm:$0xff]  ;;  %677 = vmatpush3.bf16.msra.mxu0 %v676_v17  ;;  %v710_v34 = vpack.c.bf16 %v104_v30, %v103_v29  ;;  %v74_v36 = vld [vmem:[#allocation5 + $0xb8] sm:$0xff]  ;;  %v927_v21 = vsub.s32 %v170_v2, %v172_v3 }
  0x32   :  { %v57_v37 = vld [vmem:[#allocation5 + $0x30] sm:$0xff]  ;;  %679 = vmatprep.subr.bf16.mxu0 %v678_v26  ;;  %v712_v38 = vpack.c.bf16 %v88_v32, %v87_v31  ;;  %v682_v39 = vpack.c.bf16 %v74_v36, %v73_v35  ;;  %v58_v40 = vld [vmem:[#allocation5 + $0x38] sm:$0xff]  ;;  %v75_v46 = vld [vmem:[#allocation5 + $0xc0] sm:$0xff] }
  0x33   :  { %709 = vmatpush3.bf16.msra.mxu1 %v708_v25  ;;  %v105_v41 = vld [vmem:[#allocation5 + $0x1b0] sm:$0xff]  ;;  %v106_v42 = vld [vmem:[#allocation5 + $0x1b8] sm:$0xff]  ;;  %v76_v47 = vld [vmem:[#allocation5 + $0xc8] sm:$0xff]  ;;  %v684_v48 = vpack.c.bf16 %v58_v40, %v57_v37 }
  0x34   :  { %711 = vmatprep.subr.bf16.mxu1 %v710_v34  ;;  %v714_v43 = vpack.c.bf16 %v106_v42, %v105_v41  ;;  %v89_v44 = vld [vmem:[#allocation5 + $0x130] sm:$0xff]  ;;  %v90_v45 = vld [vmem:[#allocation5 + $0x138] sm:$0xff]  ;;  %v107_v49 = vld [vmem:[#allocation5 + $0x1c0] sm:$0xff]  ;;  %v686_v55 = vpack.c.bf16 %v76_v47, %v75_v46 }
  0x35   :  { %681 = vmatpush3.bf16.msra.mxu0 %v680_v33  ;;  %v108_v50 = vld [vmem:[#allocation5 + $0x1c8] sm:$0xff]  ;;  %v716_v54 = vpack.c.bf16 %v90_v45, %v89_v44  ;;  %v59_v56 = vld [vmem:[#allocation5 + $0x40] sm:$0xff]  ;;  %v77_v61 = vld [vmem:[#allocation5 + $0xd0] sm:$0xff] }
  0x36   :  { %683 = vmatprep.subr.bf16.mxu0 %v682_v39  ;;  %v60_v57 = vld [vmem:[#allocation5 + $0x48] sm:$0xff]  ;;  %v91_v58 = vld [vmem:[#allocation5 + $0x140] sm:$0xff]  ;;  %v718_v59 = vpack.c.bf16 %v108_v50, %v107_v49  ;;  %v78_v62 = vld [vmem:[#allocation5 + $0xd8] sm:$0xff] }
  0x37   :  { %713 = vmatpush3.bf16.msra.mxu1 %v712_v38  ;;  %v92_v60 = vld [vmem:[#allocation5 + $0x148] sm:$0xff]  ;;  %v109_v63 = vld [vmem:[#allocation5 + $0x1d0] sm:$0xff]  ;;  %v110_v0 = vld [vmem:[#allocation5 + $0x1d8] sm:$0xff]  ;;  %v688_v1 = vpack.c.bf16 %v60_v57, %v59_v56  ;;  %v690_v5 = vpack.c.bf16 %v78_v62, %v77_v61 }
  0x38   :  { %715 = vmatprep.subr.bf16.mxu1 %v714_v43  ;;  %v720_v4 = vpack.c.bf16 %v92_v60, %v91_v58  ;;  %v61_v6 = vld [vmem:[#allocation5 + $0x50] sm:$0xff]  ;;  %v62_v7 = vld [vmem:[#allocation5 + $0x58] sm:$0xff]  ;;  %v722_v9 = vpack.c.bf16 %v110_v0, %v109_v63  ;;  %v79_v11 = vld [vmem:[#allocation5 + $0xe0] sm:$0xff]  ;;  %v877_v63 = vmov 0.0|0.0  }
  0x39   :  { %685 = vmatpush3.bf16.msra.mxu0 %v684_v48  ;;  %v93_v8 = vld [vmem:[#allocation5 + $0x150] sm:$0xff]  ;;  %v94_v10 = vld [vmem:[#allocation5 + $0x158] sm:$0xff]  ;;  %v80_v12 = vld [vmem:[#allocation5 + $0xe8] sm:$0xff]  ;;  %v692_v17 = vpack.c.bf16 %v62_v7, %v61_v6 }
  0x3a   :  { %687 = vmatprep.subr.bf16.mxu0 %v686_v55  ;;  %v63_v13 = vld [vmem:[#allocation5 + $0x60] sm:$0xff]  ;;  %v64_v14 = vld [vmem:[#allocation5 + $0x68] sm:$0xff]  ;;  %v81_v20 = vld [vmem:[#allocation5 + $0xf0] sm:$0xff]  ;;  %v724_v22 = vpack.c.bf16 %v94_v10, %v93_v8  ;;  %v694_v23 = vpack.c.bf16 %v80_v12, %v79_v11  ;;  %v879_v10 = vmov 0.0  }
  0x3b   :  { %717 = vmatpush3.bf16.msra.mxu1 %v716_v54  ;;  %v111_v15 = vld [vmem:[#allocation5 + $0x1e0] sm:$0xff]  ;;  %v112_v16 = vld [vmem:[#allocation5 + $0x1e8] sm:$0xff]  ;;  %v82_v25 = vld [vmem:[#allocation5 + $0xf8] sm:$0xff]  ;;  %v696_v30 = vpack.c.bf16 %v64_v14, %v63_v13 }
  0x3c   :  { %719 = vmatprep.subr.bf16.mxu1 %v718_v59  ;;  %v95_v18 = vld [vmem:[#allocation5 + $0x160] sm:$0xff]  ;;  %v96_v19 = vld [vmem:[#allocation5 + $0x168] sm:$0xff]  ;;  %v726_v24 = vpack.c.bf16 %v112_v16, %v111_v15  ;;  %v113_v28 = vld [vmem:[#allocation5 + $0x1f0] sm:$0xff]  ;;  %v698_v36 = vpack.c.bf16 %v82_v25, %v81_v20 }
  0x3d   :  { %689 = vmatpush3.bf16.msra.mxu0 %v688_v1  ;;  %v782_v26 = vld [vmem:[#allocation2] ss:$14 sps:$4 sm:$0xff]   ;;  %v784_v27 = vld [vmem:[#allocation2 + $0x1c] ss:$14 sps:$4 sm:$0xff]   ;;  %v786_v33 = vld [vmem:[#allocation2 + $0x4] ss:$14 sps:$4 sm:$0xff]   ;;  %v728_v35 = vpack.c.bf16 %v96_v19, %v95_v18 }
  0x3e   :  { %691 = vmatprep.subr.bf16.mxu0 %v690_v5  ;;  %v114_v29 = vld [vmem:[#allocation5 + $0x1f8] sm:$0xff]  ;;  %v174_v31 = vrot.slane %v782_v26, %v927_v21  ;;  %v188_v32 = vrot.slane %v784_v27, %v927_v21  ;;  %v65_v37 = vld [vmem:[#allocation5 + $0x70] sm:$0xff]  ;;  %v131_v43 = vld [vmem:[#allocation5 + $0x280] sm:$0xff]  ;;  %v181_v45 = vrot.slane %v786_v33, %v927_v21 }
  0x3f   :  { %721 = vmatpush3.bf16.msra.mxu1 %v720_v4  ;;  %v787_v34 = vld [vmem:[#allocation2 + $0x20] ss:$14 sps:$4 sm:$0xff]   ;;  %v730_v40 = vpack.c.bf16 %v114_v29, %v113_v28  ;;  %v115_v51 = vld [vmem:[#allocation5 + $0x200] sm:$0xff]  ;;  %v791_v7 = vld [vmem:[#allocation2 + $0x24] ss:$14 sps:$4 sm:$0xff]  }
  0x40   :  { %723 = vmatprep.subr.bf16.mxu1 %v722_v9  ;;  %v66_v38 = vld [vmem:[#allocation5 + $0x78] sm:$0xff]  ;;  %v97_v39 = vld [vmem:[#allocation5 + $0x170] sm:$0xff]  ;;  %v197_v41 = vcombine.high %v174_v31, %v188_v32  ;;  %v132_v44 = vld [vmem:[#allocation5 + $0x288] sm:$0xff]  ;;  %v195_v46 = vrot.slane %v787_v34, %v927_v21  ;;  %v196_v55 = vcombine.low %v174_v31, %v188_v32  ;;  %v224_v16 = vrot.slane %v791_v7, %v927_v21 }
  0x41   :  { %693 = vmatpush3.bf16.msra.mxu0 %v692_v17  ;;  %v98_v42 = vld [vmem:[#allocation5 + $0x178] sm:$0xff]  ;;  %v700_v47 = vpack.c.bf16 %v66_v38, %v65_v37  ;;  %v734_v50 = vpack.c.bf16 %v132_v44, %v131_v43  ;;  %v116_v52 = vld [vmem:[#allocation5 + $0x208] sm:$0xff]  ;;  %v133_v53 = vld [vmem:[#allocation5 + $0x290] sm:$0xff] }
  0x42   :  { %695 = vmatprep.subr.bf16.mxu0 %v694_v23  ;;  %308 = vmatprep.mubr.f32.mxu0 %v197_v41  ;;  %v199_v48 = vcombine.high %v181_v45, %v195_v46  ;;  %v732_v49 = vpack.c.bf16 %v98_v42, %v97_v39  ;;  %v134_v54 = vld [vmem:[#allocation5 + $0x298] sm:$0xff]  ;;  %v736_v56 = vpack.c.bf16 %v116_v52, %v115_v51  ;;  %v117_v59 = vld [vmem:[#allocation5 + $0x210] sm:$0xff]  ;;  %v135_v61 = vld [vmem:[#allocation5 + $0x2a0] sm:$0xff] }
  0x43   :  { %725 = vmatpush3.bf16.msra.mxu1 %v724_v22  ;;  %v198_v57 = vcombine.low %v181_v45, %v195_v46  ;;  %v738_v58 = vpack.c.bf16 %v134_v54, %v133_v53  ;;  %v118_v60 = vld [vmem:[#allocation5 + $0x218] sm:$0xff]  ;;  %v136_v62 = vld [vmem:[#allocation5 + $0x2a8] sm:$0xff]  ;;  %v119_v0 = vld [vmem:[#allocation5 + $0x220] sm:$0xff] }
  0x44   :  { %727 = vmatprep.subr.bf16.mxu1 %v726_v24  ;;  %378 = vmatprep.mubr.f32.mxu1 %v199_v48  ;;  %v120_v1 = vld [vmem:[#allocation5 + $0x228] sm:$0xff]  ;;  %v740_v2 = vpack.c.bf16 %v118_v60, %v117_v59  ;;  %v788_v3 = vld [vmem:[#allocation2 + $0x8] ss:$14 sps:$4 sm:$0xff]   ;;  %v790_v4 = vld [vmem:[#allocation2 + $0xc] ss:$14 sps:$4 sm:$0x33]   ;;  %v742_v6 = vpack.c.bf16 %v136_v62, %v135_v61 }
  0x45   :  { %697 = vmatpush3.bf16.msra.mxu0 %v696_v30  ;;  %v147_v5 = vld [vmem:[#allocation5 + $0x300] sm:$0xff]  ;;  %v793_v8 = vld [vmem:[#allocation2 + $0x28] ss:$14 sps:$4 sm:$0x33]   ;;  %v148_v9 = vld [vmem:[#allocation5 + $0x308] sm:$0xff]  ;;  %v210_v13 = vrot.slane %v788_v3, %v927_v21  ;;  %v217_v14 = vrot.slane %v790_v4, %v927_v21  ;;  %v744_v18 = vpack.c.bf16 %v120_v1, %v119_v0 }
  0x46   :  { %699 = vmatprep.subr.bf16.mxu0 %v698_v36  ;;  %v137_v11 = vld [vmem:[#allocation5 + $0x2b0] sm:$0xff]  ;;  %v138_v12 = vld [vmem:[#allocation5 + $0x2b8] sm:$0xff]  ;;  %v767_v15 = vpack.c.bf16 %v148_v9, %v147_v5  ;;  %v231_v17 = vrot.slane %v793_v8, %v927_v21  ;;  %v139_v25 = vld [vmem:[#allocation5 + $0x2c0] sm:$0xff] }
  0x47   :  { %729 = vmatpush3.bf16.msra.mxu1 %v728_v35  ;;  %v746_v19 = vpack.c.bf16 %v138_v12, %v137_v11  ;;  %v121_v20 = vld [vmem:[#allocation5 + $0x230] sm:$0xff]  ;;  %v122_v22 = vld [vmem:[#allocation5 + $0x238] sm:$0xff]  ;;  %v233_v23 = vcombine.high %v210_v13, %v224_v16  ;;  %v140_v26 = vld [vmem:[#allocation5 + $0x2c8] sm:$0xff] }
  0x48   :  { %731 = vmatprep.subr.bf16.mxu1 %v730_v40  ;;  %v234_v24 = vcombine.low %v217_v14, %v231_v17  ;;  %v748_v27 = vpack.c.bf16 %v122_v22, %v121_v20  ;;  %v750_v28 = vpack.c.bf16 %v140_v26, %v139_v25  ;;  %v123_v29 = vld [vmem:[#allocation5 + $0x240] sm:$0xff]  ;;  %v124_v21 = vld [vmem:[#allocation5 + $0x248] sm:$0xff]  ;;  %v141_v30 = vld [vmem:[#allocation5 + $0x2d0] sm:$0xff] }
  0x49   :  { %701 = vmatpush3.bf16.msra.mxu0 %v700_v47  ;;  %v142_v31 = vld [vmem:[#allocation5 + $0x2d8] sm:$0xff]  ;;  %v752_v32 = vpack.c.bf16 %v124_v21, %v123_v29  ;;  %v125_v34 = vld [vmem:[#allocation5 + $0x250] sm:$0xff]  ;;  %v143_v36 = vld [vmem:[#allocation5 + $0x2e0] sm:$0xff] }
  0x4a   :  { %735 = vmatprep.subr.bf16.mxu0 %v734_v50  ;;  %v754_v33 = vpack.c.bf16 %v142_v31, %v141_v30  ;;  %v126_v35 = vld [vmem:[#allocation5 + $0x258] sm:$0xff]  ;;  %v144_v37 = vld [vmem:[#allocation5 + $0x2e8] sm:$0xff]  ;;  %v127_v40 = vld [vmem:[#allocation5 + $0x260] sm:$0xff] }
  0x4b   :  { %733 = vmatpush3.bf16.msra.mxu1 %v732_v49  ;;  %v756_v38 = vpack.c.bf16 %v126_v35, %v125_v34  ;;  %v758_v39 = vpack.c.bf16 %v144_v37, %v143_v36  ;;  %v128_v41 = vld [vmem:[#allocation5 + $0x268] sm:$0xff]  ;;  %v145_v42 = vld [vmem:[#allocation5 + $0x2f0] sm:$0xff]  ;;  %v146_v43 = vld [vmem:[#allocation5 + $0x2f8] sm:$0xff]  ;;  %v232_v49 = vcombine.low %v210_v13, %v224_v16 }
  0x4c   :  { %766 = vmatprep.subr.bf16.mxu1 %v877_v63  ;;  %309 = vmatmul.mubr.f32.vlgmr.msra.gmra.mrb[0].mxu0 %v196_v55  ;;  %v760_v44 = vpack.c.bf16 %v128_v41, %v127_v40  ;;  %v762_v45 = vpack.c.bf16 %v146_v43, %v145_v42  ;;  %v129_v46 = vld [vmem:[#allocation5 + $0x270] sm:$0xff]  ;;  %v130_v47 = vld [vmem:[#allocation5 + $0x278] sm:$0xff]  ;;  %v553_v51 = vld [vmem:[%s954_s2] ss:$0 sm:$0xff] }
  0x4d   :  { %737 = vmatpush3.bf16.msra.mxu0 %v736_v56  ;;  %448 = vmatprep.mubr.f32.mxu0 %v233_v23  ;;  %v764_v48 = vpack.c.bf16 %v130_v47, %v129_v46 }
  0x4e   :  { %379 = vmatmul.mubr.f32.vlgmr.msra.gmra.mrb[0].mxu1 %v198_v57  ;;  %739 = vmatprep.subr.bf16.mxu0 %v738_v58 }
  0x4f   :  { %667 = vmatprep.mubr.msk.f32.mxu1 %vm878_vm0, %v879_v10  ;;  %768 = vmatpush3.bf16.msra.mxu1 %v767_v15 }
  0x51   :  { %741 = vmatpush3.bf16.msra.mxu0 %v740_v2 }
  0x52   :  { %743 = vmatprep.subr.bf16.mxu0 %v742_v6  ;;  %668 = vmatmul.mubr.msk.f32.vlgmr.msra.gmra.mrb[2].mxu1 %vm241_vm1, %v234_v24 }
  0x55   :  { %745 = vmatpush3.bf16.msra.mxu0 %v744_v18 }
  0x56   :  { %747 = vmatprep.subr.bf16.mxu0 %v746_v19 }
  0x59   :  { %749 = vmatpush3.bf16.msra.mxu0 %v748_v27 }
  0x5a   :  { %751 = vmatprep.subr.bf16.mxu0 %v750_v28 }
  0x5d   :  { %753 = vmatpush3.bf16.msra.mxu0 %v752_v32 }
  0x5e   :  { %755 = vmatprep.subr.bf16.mxu0 %v754_v33 }
  0x61   :  { %757 = vmatpush3.bf16.msra.mxu0 %v756_v38 }
  0x62   :  { %759 = vmatprep.subr.bf16.mxu0 %v758_v39 }
  0x65   :  { %761 = vmatpush3.bf16.msra.mxu0 %v760_v44 }
  0x66   :  { %763 = vmatprep.subr.bf16.mxu0 %v762_v45 }
  0x69   :  { %765 = vmatpush3.bf16.msra.mxu0 %v764_v48 }
  0x6c   :  { %449 = vmatmul.mubr.f32.vlgmr.msra.gmra.mrb[2].mxu0 %v232_v49 }
 0x11f   :  { %v587_v50 = vpop.f32.mrb[0].mxu0 }
 0x120   :  { %v588_v52 = vpop.f32.mrb[1].mxu0 }
 0x121   :  { %v622_v53 = vpop.f32.mrb[0].mxu1  ;;  %v589_v54 = vadd.f32 %v588_v52, %v587_v50 }
 0x122   :  { %v623_v55 = vpop.f32.mrb[1].mxu1 }
 0x123   :  { %v624_v56 = vadd.f32 %v623_v55, %v622_v53  ;;  %v311_v57 = vadd.f32 %v589_v54, %v553_v51 }
 0x125   :  { %v381_v58 = vadd.f32 %v624_v56, %v311_v57  ;;  %v520_v59 = vpop.f32.mrb[2].mxu1 }
 0x126   :  { %v669_v60 = vpop.f32.mrb[3].mxu1 }
 0x13f   :  { %v657_v61 = vpop.f32.mrb[2].mxu0 }
 0x140   :  { %v658_v62 = vpop.f32.mrb[3].mxu0 }
 0x141   :  { %v659_v63 = vadd.f32 %v658_v62, %v657_v61 }
 0x143   :  { %v451_v0 = vadd.f32 %v659_v63, %v381_v58 }
 0x145   :  { %v521_v1 = vadd.f32 %v520_v59, %v451_v0 }
 0x147   :  { %524 = vmax.xlane.f32.xlu0 %v521_v1 }
 0x1d4   :  { %v525_v2 = vpop.xlane.xlu0 %524 }
 0x1d5   :  { %v526_v3 = vsub.f32 %v521_v1, %v525_v2 }
 0x1d7   :  { %v527_v4 = vmul.f32 1.442695, %v526_v3 }
 0x1d9   :  { %794 = vpow2.f32 %v527_v4 }
 0x1e3   :  { %v795_v5 = vpop.eup %794 }
 0x1e4   :  { %529 = vadd.xlane.f32.xlu0 %v795_v5 }
 0x271   :  { %v530_v6 = vpop.xlane.xlu0 %529 }
 0x272   :  { %796 = vlog2.f32 %v530_v6 }
 0x27c   :  { %v797_v7 = vpop.eup %796 }
 0x27d   :  { %v532_v8 = vmul.f32 0.6931472, %v797_v7 }
 0x27f   :  { %v533_v9 = vsub.f32 %v526_v3, %v532_v8 }
 0x281   :  { %534 = vst [vmem:[#allocation7] sm:$0xff] %v533_v9 }
 0x282   :  { %539 = vsyncadd [#allocation4], 96  ;;  %s880_s2 = smov [#allocation7]  }
 0x283   :  { %s540_s14 = sshll.u32 %s880_s2, 4  ;;  %s541_s14 = int_to_ptr.vmem [resolvable:$true] %s540_s14 }
 0x284   :  { %s842_s15 = scalar_lea.vmem %s541_s14, 32  ;;  %s846_s16 = scalar_lea.vmem %s541_s14, 128 }
 0x285   :  { %p843_p2 = scmp.ne.s32.totalorder %s541_s14, %s842_s15  ;;  %p847_p3 = scmp.lt.s32.totalorder %s541_s14, %s541_s14 }
 0x286   :  { %p848_p4 = scmp.lt.s32.totalorder %s846_s16, %s842_s15 }
 0x288   :  { %p849_p5 = por %p848_p4, %p847_p3 }
 0x28a   :  { %p850_p6 = pnand %p849_p5, %p843_p2 }
 0x28c   :  { %853 = shalt.err (!%p850_p6)
}
 0x28d   :  { %s854_s19 = scalar_lea.hbm %s955_s3, 32 }
 0x28e   :  { %p855_p7 = scmp.ne.s32.totalorder %s955_s3, %s854_s19  ;;  %p858_p8 = scmp.lt.u32.totalorder %s854_s19, %s955_s3 }
 0x290   :  { %p860_p9 = pnand %p858_p8, %p855_p7 }
 0x292   :  { %863 = shalt.err (!%p860_p9)
}
 0x293   :  { %s881_s24 = smov 32   ;;  %s882_s25 = smov 2  }
 0x294   :  { %546 = dma.vmem_to_hbm [thread:$0]  %s541_s14, 32, %s955_s3, [#allocation4], %s881_s24, %s881_s24, %s882_s25  }
 0x295   :  { %868 = dma.done.wait [#allocation4], 128  }
 0x296   :  { %869 = vsyncadd [#allocation4], 4294967168 }
 0x297   :  { %550 = vsyncpa [#allocation3], 1 }
 0x298   :  { %551 = vsyncpa [#allocation6], 1 }
 0x299   :  { %552 = vsyncpa [#allocation4], 1 }

</bundles_post_ra>
